<compile_context>
chip_gen: v5e
topology: v5e:2x2
jax: 0.10.0
libtpu: 0.0.40
codegen_flags: <defaults>
</compile_context>

<pallas_src>
import jax
import jax.numpy as jnp
import numpy as np
from jax.experimental import pallas as pl
from jax.experimental.pallas import tpu as pltpu

DROP_P = 0.2
_VMEM_PIPELINE_BUDGET = 16 * 1024 * 1024   # target for double-buffered block set
_VMEM_LIMIT_BYTES = 32 * 1024 * 1024       # explicit scoped-VMEM limit (safe on v5e/v6e/v7x)


def _reprogram_kernel(p_ref, x_ref, o_ref):
    # p_ref : (s_tile, L)    dropout-applied perturbation chunk (batch-shared)
    # x_ref : (1, s_tile, L) one batch element's chunk
    # o_ref : (1, s_tile, L)
    t = jnp.tanh(p_ref[...])                     # EUP; recomputed per batch step (cheap)
    x = x_ref[...]
    # tanh(atanh(x) + p) == (x + t) / (1 + x*t) for |x| < 1.
    # Exact divide kept for tight numerics; pl.reciprocal(..., approx=True) is a
    # valid micro-opt if a few ULPs are acceptable.
    o_ref[...] = (x + t) / (1.0 + x * t)


def _choose_layout(n):
    """(S, L) with S*L == n; lane-dense L = 128 when possible."""
    if n % 128 == 0:
        return n // 128, 128
    # Fallback: full-extent block (always legal); not sublane-dense but correct.
    return 1, n


def _pick_s_tile(s, l, b, budget_bytes=_VMEM_PIPELINE_BUDGET):
    """Largest multiple-of-8 divisor of s whose double-buffered block set fits budget."""
    if s % 8 != 0:
        return s
    # Per grid step we pipeline x-block + out-block + p-block, f32, double-buffered.
    max_elems = max(8 * l, budget_bytes // (4 * 2 * 3))
    best, st = 8, 16
    while st <= s:
        if s % st == 0 and st * l <= max_elems:
            best = st
        st += 8
    # v7x megacore: keep >= 2 total 'parallel' grid steps so both TCs get work.
    if b == 1 and best == s and s % 16 == 0:
        best = s // 2
    return best


def reprogram_forward(x, P, key, *, training=True):
    """Pallas equivalent of Program.forward.

    x:   (B, C, H, W) float32 image data in [0, 1)
    P:   (C, H, W)    float32 perturbation parameter
    key: jax PRNG key driving the dropout mask (one mask, shared across batch,
         matching torch's single self.dropout(self.P) evaluation).
    """
    B, C, H, W = x.shape
    N = C * H * W
    S, L = _choose_layout(N)

    # ---- one-shot prep: single batch-shared dropout draw -------------------
    # TODO(synk): torch's dropout RNG stream cannot be bit-matched; any mask with
    # keep-prob 0.8 is semantically equivalent. The tanh is fused into the kernel.
    p = P.reshape(S, L).astype(x.dtype)
    if training:
        keep = jax.random.bernoulli(key, 1.0 - DROP_P, shape=(S, L))
        p_drop = jnp.where(keep, p * (1.0 / (1.0 - DROP_P)), 0.0).astype(x.dtype)
    else:
        p_drop = p

    x3 = x.reshape(B, S, L)

    s_tile = _pick_s_tile(S, L, B)
    grid = (S // s_tile, B)        # batch innermost: p_drop block stays VMEM-resident

    out = pl.pallas_call(
        _reprogram_kernel,
        out_shape=jax.ShapeDtypeStruct((B, S, L), x.dtype),
        grid=grid,
        in_specs=[
            pl.BlockSpec((s_tile, L), lambda i, b: (i, 0)),        # p_drop (S, L)
            pl.BlockSpec((1, s_tile, L), lambda i, b: (b, i, 0)),  # x (B, S, L)
        ],
        out_specs=pl.BlockSpec((1, s_tile, L), lambda i, b: (b, i, 0)),
        compiler_params=pltpu.CompilerParams(
            dimension_semantics=("parallel", "parallel"),
            vmem_limit_bytes=_VMEM_LIMIT_BYTES,
        ),
    )(p_drop, x3)
    return out.reshape(B, C, H, W)


def _atanh_ref(x):
    return 0.5 * (jnp.log(1.0 + x + 1e-15) - jnp.log(1.0 - x + 1e-15))


if __name__ == "__main__":
    # Shapes consistent with the module: cfg.channels=4, cfg.h1=16, cfg.w1=16.
    B, C, H, W = 2, 4, 16, 16
    N = C * H * W

    key = jax.random.PRNGKey(0)
    kx, kdrop = jax.random.split(key)
    # Image-like data in [0, 0.99) so the logit/atanh term is finite.
    x = jax.random.uniform(kx, (B, C, H, W), dtype=jnp.float32,
                           minval=0.0, maxval=0.99)

    # 1) P initialized exactly as the module does: zeros -> dropout(P) == 0.
    P0 = jnp.zeros((C, H, W), dtype=jnp.float32)
    out = jax.block_until_ready(reprogram_forward(x, P0, kdrop, training=True))
    ref = jnp.tanh(_atanh_ref(x))
    np.testing.assert_allclose(np.asarray(out), np.asarray(ref), rtol=3e-5, atol=3e-5)

    # 2) Nonzero P, training mode, against a pure-JAX reference using the same
    #    (batch-shared) dropout mask as the wrapper draws.
    P2 = jax.random.normal(jax.random.PRNGKey(7), (C, H, W), jnp.float32) * 0.1
    S, L = _choose_layout(N)
    keep = jax.random.bernoulli(kdrop, 1.0 - DROP_P, shape=(S, L))
    p_drop = jnp.where(keep, P2.reshape(S, L) * (1.0 / (1.0 - DROP_P)), 0.0)
    ref2 = jnp.tanh(_atanh_ref(x) + p_drop.reshape(1, C, H, W))
    out2 = jax.block_until_ready(reprogram_forward(x, P2, kdrop, training=True))
    np.testing.assert_allclose(np.asarray(out2), np.asarray(ref2), rtol=3e-5, atol=3e-5)

    # 3) Nonzero P, eval mode (dropout disabled).
    ref3 = jnp.tanh(_atanh_ref(x) + P2.reshape(1, C, H, W))
    out3 = jax.block_until_ready(reprogram_forward(x, P2, kdrop, training=False))
    np.testing.assert_allclose(np.asarray(out3), np.asarray(ref3), rtol=3e-5, atol=3e-5)

    # 4) Fallback layout (N not a multiple of 128): C=3, H=W=10 -> N=300.
    Bs, Cs, Hs, Ws = 2, 3, 10, 10
    xs = jax.random.uniform(jax.random.PRNGKey(3), (Bs, Cs, Hs, Ws),
                            dtype=jnp.float32, minval=0.0, maxval=0.99)
    P3 = jax.random.normal(jax.random.PRNGKey(11), (Cs, Hs, Ws), jnp.float32) * 0.05
    out4 = jax.block_until_ready(reprogram_forward(xs, P3, kdrop, training=False))
    ref4 = jnp.tanh(_atanh_ref(xs) + P3.reshape(1, Cs, Hs, Ws))
    np.testing.assert_allclose(np.asarray(out4), np.asarray(ref4), rtol=3e-5, atol=3e-5)

    print("KERNEL_OK")
</pallas_src>

<mosaic_0001>
module attributes {stable_mosaic.version = 11 : i64} {
  func.func @_reprogram_kernel(%arg0: i32, %arg1: i32, %arg2: memref<8x128xf32, #tpu.memory_space<vmem>>, %arg3: memref<1x8x128xf32, #tpu.memory_space<vmem>>, %arg4: memref<1x8x128xf32, #tpu.memory_space<vmem>>) attributes {dimension_semantics = [#tpu.dimension_semantics<parallel>, #tpu.dimension_semantics<parallel>], iteration_bounds = array<i64: 1, 2>, scalar_prefetch = 0 : i64, scratch_operands = 0 : i64, tpu.core_type = #tpu.core_type<tc>, window_params = [{transform_indices = @transform_0, window_bounds = array<i64: 8, 128>}, {transform_indices = @transform_1, window_bounds = array<i64: 1, 8, 128>}, {transform_indices = @transform_2, window_bounds = array<i64: 1, 8, 128>}]} {
    %c0 = arith.constant 0 : index
    %c0_0 = arith.constant 0 : index
    %0 = vector.load %arg2[%c0, %c0_0] : memref<8x128xf32, #tpu.memory_space<vmem>>, vector<8x128xf32>
    %1 = math.tanh %0 : vector<8x128xf32>
    %c0_1 = arith.constant 0 : index
    %c0_2 = arith.constant 0 : index
    %c0_3 = arith.constant 0 : index
    %2 = vector.load %arg3[%c0_1, %c0_2, %c0_3] : memref<1x8x128xf32, #tpu.memory_space<vmem>>, vector<1x8x128xf32>
    %3 = vector.shape_cast %1 : vector<8x128xf32> to vector<1x8x128xf32>
    %4 = arith.addf %2, %3 : vector<1x8x128xf32>
    %5 = vector.shape_cast %1 : vector<8x128xf32> to vector<1x8x128xf32>
    %6 = arith.mulf %2, %5 : vector<1x8x128xf32>
    %cst = arith.constant 1.000000e+00 : f32
    %7 = vector.broadcast %cst : f32 to vector<1x8x128xf32>
    %8 = arith.addf %7, %6 : vector<1x8x128xf32>
    %9 = arith.divf %4, %8 : vector<1x8x128xf32>
    %c0_4 = arith.constant 0 : index
    %c0_5 = arith.constant 0 : index
    %c0_6 = arith.constant 0 : index
    %10 = vector.load %arg4[%c0_4, %c0_5, %c0_6] : memref<1x8x128xf32, #tpu.memory_space<vmem>>, vector<1x8x128xf32>
    tpu.vector_store %arg4[%c0_4, %c0_5, %c0_6], %9 {strides = array<i32>} : memref<1x8x128xf32, #tpu.memory_space<vmem>>, vector<1x8x128xf32>,
    return
  }
  func.func @transform_0(%arg0: i32, %arg1: i32) -> (i32, i32) {
    %c0_i32 = arith.constant 0 : i32
    %c0_i32_0 = arith.constant 0 : i32
    return %arg0, %c0_i32 : i32, i32
  }
  func.func @transform_1(%arg0: i32, %arg1: i32) -> (i32, i32, i32) {
    %c0_i32 = arith.constant 0 : i32
    %c0_i32_0 = arith.constant 0 : i32
    return %arg1, %arg0, %c0_i32 : i32, i32, i32
  }
  func.func @transform_2(%arg0: i32, %arg1: i32) -> (i32, i32, i32) {
    %c0_i32 = arith.constant 0 : i32
    %c0_i32_0 = arith.constant 0 : i32
    return %arg1, %arg0, %c0_i32 : i32, i32, i32
  }
}

</mosaic_0001>

<bundles_post_ra>
// kernel: tpu_custom_call.1
= control target key start
LH: loop header
LB: loop body
LE: loop exit
PB: predicated region body
PF: predicated region fallthrough
CT: control target
= control target key end

     0   :  { %7 = vsyncpa [#allocation3], 0  ;;  %s738_s0 = inlined_call_operand.hbm [shape: f32[8,128], index: 0, kind: input, shape index: {}]   ;;  %s739_s1 = inlined_call_operand.hbm [shape: f32[2,8,128], index: 1, kind: input, shape index: {}]   ;;  %s740_s2 = inlined_call_operand.hbm [shape: f32[2,8,128], index: 2, kind: output, shape index: {}]  }
   0x1   :  { %8 = vsyncpa [#allocation6], 0 }
   0x2   :  { %10 = vsyncpa [#allocation6 + $0x1], 0 }
   0x3   :  { %11 = vsyncpa [#allocation4], 0 }
   0x4   :  { %13 = vsyncpa [#allocation4 + $0x1], 0  ;;  %s589_s9 = smov 0   ;;  %s591_s10 = smov 0  }
   0x5   :  { %s593_s11 = smov 0   ;;  %s595_s12 = smov 0  }
   0x6   :  { %s597_s13 = smov 0   ;;  %s599_s14 = smov 0  }
   0x7 LB: > { %s333_s15 = sadd.s32 4294967295, %s571_s14   ;;  %s334_s16 = sadd.s32 4294967294, %s571_s14   ;;  %s571_s14 = sphi %s599_s14, %s19_s14   ;;  %s567_s13 = sphi %s597_s13, %s752_s13   ;;  %s563_s12 = sphi %s595_s12, %s751_s12   ;;  %s559_s11 = sphi %s593_s11, %s750_s11   ;;  %s555_s10 = sphi %s591_s10, %s749_s10   ;;  %s551_s9 = sphi %s589_s9, %s748_s9  }
   0x8   : > { %p79_p0 = scmp.ne.s32.totalorder %s555_s10, %s551_s9  ;;  %p623_p1 = scmp.eq.s32.totalorder %s333_s15, 0 }
   0x9   : > { %p627_p2 = scmp.eq.s32.totalorder %s333_s15, 1  ;;  %p111_p3 = scmp.eq.s32.totalorder %s334_s16, 1 }
   0xa   : > { %p633_p4 = por %p623_p1, %p79_p0  ;;  %p335_p5 = scmp.ge.s32.totalorder %s571_s14, 1 }
   0xb   : > { %p638_p6 = por %p111_p3, %p79_p0  ;;  %p118_p7 = scmp.lt.s32.totalorder %s571_s14, 3 }
   0xc   : > { %s132_s23 = sshll.u32 %s738_s0, 4  ;;  %p337_p9 = scmp.ge.s32.totalorder %s571_s14, 2  ;;  %s133_s23 = int_to_ptr.hbm [resolvable:$true] %s132_s23 }
   0xd   : > { %p646_p8 = pnand %p335_p5, %p118_p7  ;;  %s573_s25 = smov [#allocation2]  }
   0xe   : > { %s134_s26 = sshll.u32 %s573_s25, 4  ;;  %s28_s27 = sadd.s32 1, %s567_s13  ;;  %s135_s26 = int_to_ptr.vmem [resolvable:$true] %s134_s26 }
   0xf   : > { %p356_p10 = pneg %p646_p8  ;;  %p29_p12 = scmp.ge.s32.totalorder %s28_s27, 2 }
  0x10   : > { %s66_s28 = sadd.s32 1, %s559_s11  ;;  %p73_p13 = scmp.ne.s32.totalorder %s559_s11, %s555_s10 }
  0x11   : > { %p357_p11 = pnand %p356_p10, %p623_p1  ;;  %p74_p0 = scmp.eq.s32.totalorder %s571_s14, 0 }
  0x12   : > { %s754_s27 = smov (%p29_p12, %s28_s27), 0  ;;  %p668_p5 = por %p627_p2, %p73_p13 }
  0x13   : > { %359 = dma.hbm_to_vmem [thread:$0]  (!%p357_p11), %s133_s23, 128, %s135_s26, [#allocation3]  }
  0x14   : > { %p662_p3 = por %p74_p0, %p73_p13  ;;  %s61_s3 = ssub.s32 %s567_s13, %s754_s27 }
  0x15   : > { %p369_p7 = scmp.lt.s32.totalorder %s571_s14, 2  ;;  %p64_p10 = scmp.eq.s32.totalorder %s61_s3, 0 }
  0x16   : > { %s145_s4 = sand.u32 1, %s559_s11   ;;  %s339_s7 = sshll.u32 %s567_s13, 3 }
  0x17   : > { %s338_s5 = sshll.u32 %s145_s4, 3  ;;  %s154_s16 = scalar_lea.hbm %s739_s1, %s339_s7 }
  0x18   : > { %s677_s6 = scalar_select %p64_p10, %s559_s11, %s66_s28  }
  0x19   : > { %s149_s21 = scalar_lea.vmem [#allocation5], %s338_s5  ;;  %s156_s18 = sshll.u32 %s154_s16, 4  ;;  %s157_s18 = int_to_ptr.hbm [resolvable:$true] %s156_s18 }
  0x1a   : > { %s158_s22 = sshll.u32 %s149_s21, 4  ;;  %p361_p2 = pnand %p369_p7, %p662_p3  ;;  %s159_s22 = int_to_ptr.vmem [resolvable:$true] %s158_s22 }
  0x1b   : > { %s146_s23 = scalar_lea.sflag [#allocation6], %s145_s4  ;;  %167 = sbr.rel (%p646_p8) target bundleno = 71 (0x47), region = 28 }
  0x1c   : > { %363 = dma.hbm_to_vmem [thread:$0]  (!%p361_p2), %s157_s18, 128, %s159_s22, %s146_s23  }
  0x20   : > { %538 = dma.done.wait (%p623_p1), [#allocation3], 128  }
  0x21   : > { %540 = vsyncadd (%p623_p1), [#allocation3], 4294967168  ;;  %s692_s25 = sand.u32 1, %s555_s10  }
  0x22   : > { %s342_s26 = sshll.u32 %s692_s25, 3  ;;  %s175_s28 = scalar_lea.sflag [#allocation6], %s692_s25 }
  0x23   : > { %s178_s29 = scalar_lea.vmem [#allocation5], %s342_s26 }
  0x24   : > { %542 = dma.done.wait (%p633_p4), %s175_s28, 128  }
  0x25   : > { %544 = vsyncadd (%p633_p4), %s175_s28, 4294967168  ;;  %v200_v0 = vld [vmem:[#allocation2] sm:$0xff]  ;;  %v202_v1 = vld [vmem:[%s178_s29] sm:$0xff]  ;;  %s345_s17 = sshll.u32 %s563_s12, 3  ;;  %s199_s4 = scalar_lea.vmem [#allocation7], %s342_s26 }
  0x26   : > { %421 = vtanh.f32 %v200_v0  ;;  %s234_s3 = scalar_lea.hbm %s740_s2, %s345_s17  ;;  %s236_s5 = sshll.u32 %s199_s4, 4  ;;  %s237_s5 = int_to_ptr.vmem [resolvable:$true] %s236_s5 }
  0x27   : > { %s238_s7 = sshll.u32 %s234_s3, 4  ;;  %s223_s12 = scalar_lea.sflag [#allocation4], %s692_s25  ;;  %s239_s7 = int_to_ptr.hbm [resolvable:$true] %s238_s7 }
  0x28   : > { %s499_s8 = sshra.s32 %s239_s7, 4  ;;  %s505_s22 = scalar_lea.hbm %s740_s2, 16  ;;  %s500_s8 = int_to_ptr.hbm [resolvable:$true] %s499_s8 }
  0x29   : > { %s501_s15 = scalar_lea.hbm %s500_s8, 8  ;;  %p506_p11 = scmp.lt.s32.totalorder %s500_s8, %s740_s2 }
  0x2a   : > { %p502_p1 = scmp.ne.s32.totalorder %s500_s8, %s501_s15  ;;  %p507_p12 = scmp.lt.s32.totalorder %s505_s22, %s501_s15 }
  0x2c   : > { %v422_v2 = vpop.eup %421  ;;  %p503_p4 = pnand %p502_p1, %p668_p5  ;;  %p508_p13 = por %p507_p12, %p506_p11 }
  0x2d   : > { %v204_v3 = vmul.f32 %v422_v2, %v202_v1  ;;  %v203_v12 = vadd.f32 %v422_v2, %v202_v1 }
  0x2e   : > { %p504_p8 = pneg %p503_p4 }
  0x2f   : > { %v205_v4 = vadd.f32 1.0, %v204_v3 }
  0x30   : > { %p509_p0 = pnand %p508_p13, %p504_p8 }
  0x31   : > { %423 = vrcp.f32 %v205_v4  ;;  %v217_v7 = vand.u32 2147483648, %v205_v4  ;;  %vm211_vm0 = vweird.f32 %v205_v4  ;;  %v215_v9 = vand.u32 2147483647, %v205_v4 }
  0x33   : > { %v218_v11 = vor.u32 1.1754944e-38, %v217_v7  ;;  %vm216_vm3 = vcmp.eq.f32.partialorder %v215_v9, 8.507059e+37 }
  0x37   : > { %v424_v5 = vpop.eup %423 }
  0x38   : > { %v207_v6 = vmul.f32 %v424_v5, %v205_v4  ;;  %vm212_vm1 = vweird.f32 %v424_v5 }
  0x39   : > { %vm213_vm2 = vmor %vm211_vm0, %vm212_vm1 }
  0x3a   : > { %v208_v8 = vsub.f32 1.0, %v207_v6 }
  0x3c   : > { %v209_v10 = vmul.f32 %v424_v5, %v208_v8 }
  0x3e   : > { %v210_v13 = vadd.f32 %v424_v5, %v209_v10 }
  0x40   : > { %v214_v14 = vsel %vm213_vm2, %v424_v5, %v210_v13 }
  0x41   : > { %v219_v15 = vsel %vm216_vm3, %v218_v11, %v214_v14 }
  0x42   : > { %v220_v16 = vmul.f32 %v219_v15, %v203_v12 }
  0x44   : > { %221 = vst [vmem:[%s199_s4] sm:$0xff] %v220_v16 }
  0x45   : > { %512 = shalt.err (!%p509_p0)
}
  0x46   : > { %354 = dma.vmem_to_hbm [thread:$0]  (%p668_p5), %s237_s5, 128, %s239_s7, %s223_s12  }
  0x47 PF: > { %s250_s25 = sand.u32 1, %s551_s9   ;;  %p365_p3 = pnand %p337_p9, %p638_p6 }
  0x48   : > { %s251_s26 = scalar_lea.sflag [#allocation4], %s250_s25 }
  0x49   : > { %p366_p7 = pneg %p365_p3 }
  0x4b   : > { %546 = dma.done.wait (%p366_p7), %s251_s26, 128  }
  0x4c   : > { %548 = vsyncadd (%p366_p7), %s251_s26, 4294967168  ;;  %s19_s14 = sadd.s32 1, %s571_s14   ;;  %s748_s9 = smov %s555_s10 }
  0x4d   : > { %p16_p10 = scmp.ge.s32.totalorder %s19_s14, 4   ;;  %s749_s10 = smov %s559_s11 }
  0x4e   : > { %s750_s11 = smov %s677_s6  ;;  %s751_s12 = smov %s567_s13 }
  0x4f   : > { %s752_s13 = smov %s754_s27  ;;  %18 = sbr.rel (!%p16_p10) target bundleno = 7 (0x7), region = 79 }
  0x54   :  { %257 = vsyncpa [#allocation3], 1 }
  0x55   :  { %259 = vsyncpa [#allocation3 + $0x1], 1 }
  0x56   :  { %260 = vsyncpa [#allocation6], 1 }
  0x57   :  { %262 = vsyncpa [#allocation6 + $0x1], 1 }
  0x58   :  { %263 = vsyncpa [#allocation4], 1 }
  0x59   :  { %265 = vsyncpa [#allocation4 + $0x1], 1 }

</bundles_post_ra>
